<compile_context>
chip_gen: v7x
topology: tpu7x:2x2x1
jax: 0.10.0
libtpu: 0.0.40
codegen_flags: <defaults>
</compile_context>

<pallas_src>
import jax
import jax.numpy as jnp
from jax.experimental import pallas as pl
from jax.experimental.pallas import tpu as pltpu

_LANE = 128
_SUBLANE = 8


def _round_down(x, m):
    return (x // m) * m


def _choose_row_fold(B, S):
    """Smallest r | S with (B*r) % 8 == 0 and S/r still lane-dense (>=512)."""
    if B >= _SUBLANE:
        return 1
    for r in range(2, 65):
        if S % r:
            continue
        if (B * r) % _SUBLANE:
            continue
        if (S // r) < 4 * _LANE:
            continue
        return r
    return 1


def _make_dice_sums_kernel(S, s_tile, ns_per_split, needs_col_mask):
    """Kernel accumulating a = Σ p·g, b = Σ p², c = Σ g² per (folded) row."""

    def kernel(pred_ref, gt_ref, mask_ref, a_ref, b_ref, c_ref):
        si = pl.program_id(2)

        @pl.when(si == 0)
        def _init():
            a_ref[...] = jnp.zeros_like(a_ref)
            b_ref[...] = jnp.zeros_like(b_ref)
            c_ref[...] = jnp.zeros_like(c_ref)

        # Widen to f32 in VMEM (cheap VPU work) — inputs stream at native width.
        m = mask_ref[...].astype(jnp.float32)
        p = pred_ref[...].astype(jnp.float32) * m
        g = jnp.clip(gt_ref[...].astype(jnp.float32), 0.0, 1.0) * m

        if needs_col_mask:
            # Zero the ragged spatial tail (and fully out-of-range duplicate
            # blocks that an odd v7x split produces).  Use jnp.where, not a
            # multiply, so OOB garbage (possibly NaN/Inf) cannot propagate.
            blk = pl.program_id(0) * ns_per_split + si
            lane = jax.lax.broadcasted_iota(jnp.int32, p.shape, 1)
            valid = lane < (S - blk * s_tile)
            p = jnp.where(valid, p, 0.0)
            g = jnp.where(valid, g, 0.0)

        a_ref[...] += jnp.sum(p * g, axis=1, keepdims=True)
        b_ref[...] += jnp.sum(p * p, axis=1, keepdims=True)
        c_ref[...] += jnp.sum(g * g, axis=1, keepdims=True)

    return kernel


def dice_loss(pred, gt, mask, *, block_bytes=1 << 20):
    """Pallas DiceLoss.forward. pred/gt/mask: (B, H, W); mask may be int8/bool."""
    B, H, W = pred.shape
    S = H * W

    # --- free row-major views ---------------------------------------------
    fold = _choose_row_fold(B, S)            # fill sublanes when B is tiny
    B2, S2 = B * fold, S // fold
    pred2 = pred.reshape(B2, S2)
    gt2 = gt.reshape(B2, S2)
    mask2 = mask.reshape(B2, S2)

    itemsizes = [jnp.dtype(x.dtype).itemsize for x in (pred2, gt2, mask2)]

    # --- batch tile: dtype-aware sublane packing ---------------------------
    if B2 <= _SUBLANE:
        b_tile = B2                          # full dim -> always a legal block
    else:
        packing = max(1, 4 // min(itemsizes))
        b_tile = _SUBLANE * packing
        if b_tile > B2:
            b_tile = _SUBLANE
    n_b_blocks = pl.cdiv(B2, b_tile)

    # --- spatial tile: ~block_bytes for the widest-dtype input buffer ------
    s_tile = _round_down(
        max(block_bytes // (b_tile * max(itemsizes)), _LANE), _LANE)
    if s_tile >= S2:
        s_tile = S2                          # full dim -> always a legal block
    ns_total = pl.cdiv(S2, s_tile)

    # --- v7x megacore: give the parallel axes >= 2 blocks when possible ----
    n_split = 2 if (n_b_blocks == 1 and ns_total >= 2) else 1
    ns_per_split = pl.cdiv(ns_total, n_split)
    needs_col_mask = (n_split * ns_per_split * s_tile) != S2

    def in_index_map(p, bi, si):
        blk = p * ns_per_split + si
        # Clamp so duplicate blocks from an odd split keep the DMA in-bounds;
        # their contribution is zeroed by the in-kernel column mask.
        return bi, jnp.minimum(blk, ns_total - 1)

    def out_index_map(p, bi, si):
        return p, bi, 0

    in_spec = pl.BlockSpec((b_tile, s_tile), in_index_map)
    out_spec = pl.BlockSpec((None, b_tile, 1), out_index_map)
    out_shape = jax.ShapeDtypeStruct((n_split, B2, 1), jnp.float32)

    kernel = _make_dice_sums_kernel(S2, s_tile, ns_per_split, needs_col_mask)

    a, b, c = pl.pallas_call(
        kernel,
        out_shape=(out_shape, out_shape, out_shape),
        grid_spec=pltpu.PrefetchScalarGridSpec(
            num_scalar_prefetch=0,
            grid=(n_split, n_b_blocks, ns_per_split),
            in_specs=[in_spec, in_spec, in_spec],
            out_specs=(out_spec, out_spec, out_spec),
        ),
        compiler_params=pltpu.CompilerParams(
            # split / batch blocks are independent -> parallel (v7x megacore);
            # the spatial axis carries the resident accumulator -> arbitrary.
            dimension_semantics=("parallel", "parallel", "arbitrary"),
        ),
    )(pred2, gt2, mask2)

    def finalize(x):                         # (n_split, B2, 1) -> (B,)
        x = jnp.sum(x, axis=0)[:, 0]
        if fold > 1:
            x = x.reshape(B, fold).sum(axis=1)
        return x

    a, b, c = finalize(a), finalize(b), finalize(c)
    loss = 1.0 - 2.0 * a / (b + c + 1e-6)
    return jnp.mean(loss)


def _dice_loss_ref(pred, gt, mask):
    pred = pred.astype(jnp.float32)
    gt = gt.astype(jnp.float32)
    mask = mask.astype(jnp.float32)
    pred = pred * mask
    gt = jnp.clip(gt, 0.0, 1.0) * mask
    a = jnp.sum(pred * gt, axis=(1, 2))
    b = jnp.sum(pred * pred, axis=(1, 2))
    c = jnp.sum(gt * gt, axis=(1, 2))
    return jnp.mean(1.0 - 2.0 * a / (b + c + 1e-6))


if __name__ == "__main__":
    key = jax.random.PRNGKey(0)
    ks = jax.random.split(key, 15)

    def check(pred, gt, mask, **kw):
        out = jax.block_until_ready(dice_loss(pred, gt, mask, **kw))
        ref = _dice_loss_ref(pred, gt, mask)
        assert jnp.allclose(out, ref, atol=1e-5, rtol=1e-5), (out, ref)

    # 1) f32, original test shape (single block).
    B, H, W = 2, 16, 16
    pred = jax.nn.sigmoid(jax.random.normal(ks[0], (B, H, W), jnp.float32))
    gt = jax.random.uniform(ks[1], (B, H, W), jnp.float32,
                            minval=-0.5, maxval=1.5)      # exercises the clamp
    mask = (jax.random.uniform(ks[2], (B, H, W)) > 0.3).astype(jnp.float32)
    check(pred, gt, mask)

    # 2) bf16 pred/gt + int8 mask, non-128-multiple spatial (full-dim block).
    B, H, W = 4, 24, 20
    pred = jax.nn.sigmoid(
        jax.random.normal(ks[3], (B, H, W), jnp.float32)).astype(jnp.bfloat16)
    gt = jax.random.uniform(ks[4], (B, H, W), jnp.float32,
                            minval=-0.5, maxval=1.5).astype(jnp.bfloat16)
    mask = (jax.random.uniform(ks[5], (B, H, W)) > 0.3).astype(jnp.int8)
    check(pred, gt, mask)

    # 3) forced small blocks: ragged spatial tail + odd-split duplicate block.
    B, H, W = 2, 15, 20
    pred = jax.nn.sigmoid(jax.random.normal(ks[6], (B, H, W), jnp.float32))
    gt = jax.random.uniform(ks[7], (B, H, W), jnp.float32,
                            minval=-0.5, maxval=1.5)
    mask = (jax.random.uniform(ks[8], (B, H, W)) > 0.3).astype(jnp.float32)
    check(pred, gt, mask, block_bytes=1024)

    # 4) batch > 8 with a ragged last batch block.
    B, H, W = 10, 9, 14
    pred = jax.nn.sigmoid(jax.random.normal(ks[9], (B, H, W), jnp.float32))
    gt = jax.random.uniform(ks[10], (B, H, W), jnp.float32,
                            minval=-0.5, maxval=1.5)
    mask = (jax.random.uniform(ks[11], (B, H, W)) > 0.3).astype(jnp.float32)
    check(pred, gt, mask)

    # 5) tiny batch + large spatial: row-fold view + 2-way spatial split.
    B, H, W = 2, 32, 64
    pred = jax.nn.sigmoid(jax.random.normal(ks[12], (B, H, W), jnp.float32))
    gt = jax.random.uniform(ks[13], (B, H, W), jnp.float32,
                            minval=-0.5, maxval=1.5)
    mask = (jax.random.uniform(ks[14], (B, H, W)) > 0.3).astype(jnp.float32)
    check(pred, gt, mask, block_bytes=8192)

    print("KERNEL_OK")
</pallas_src>

<mosaic_0001>
module attributes {stable_mosaic.version = 11 : i64} {
  func.func @kernel(%arg0: i32, %arg1: i32, %arg2: i32, %arg3: memref<2x256xf32, #tpu.memory_space<vmem>>, %arg4: memref<2x256xf32, #tpu.memory_space<vmem>>, %arg5: memref<2x256xf32, #tpu.memory_space<vmem>>, %arg6: memref<1x2x1xf32, #tpu.memory_space<vmem>>, %arg7: memref<1x2x1xf32, #tpu.memory_space<vmem>>, %arg8: memref<1x2x1xf32, #tpu.memory_space<vmem>>) attributes {dimension_semantics = [#tpu.dimension_semantics<parallel>, #tpu.dimension_semantics<parallel>, #tpu.dimension_semantics<arbitrary>], iteration_bounds = array<i64: 1, 1, 1>, scalar_prefetch = 0 : i64, scratch_operands = 0 : i64, tpu.core_type = #tpu.core_type<tc>, window_params = [{transform_indices = @transform_0, window_bounds = array<i64: 2, 256>}, {transform_indices = @transform_1, window_bounds = array<i64: 2, 256>}, {transform_indices = @transform_2, window_bounds = array<i64: 2, 256>}, {transform_indices = @transform_3, window_bounds = array<i64: 1, 2, 1>}, {transform_indices = @transform_4, window_bounds = array<i64: 1, 2, 1>}, {transform_indices = @transform_5, window_bounds = array<i64: 1, 2, 1>}]} {
    %c0_i32 = arith.constant 0 : i32
    %0 = arith.cmpi eq, %arg2, %c0_i32 : i32
    %1 = arith.extui %0 : i1 to i32
    %c0_i32_0 = arith.constant 0 : i32
    %2 = arith.cmpi ne, %1, %c0_i32_0 : i32
    scf.if %2 {
      %cst_28 = arith.constant 0.000000e+00 : f32
      %39 = vector.broadcast %cst_28 : f32 to vector<2x1xf32>
      %c0_29 = arith.constant 0 : index
      %c0_30 = arith.constant 0 : index
      %c0_31 = arith.constant 0 : index
      %40 = vector.load %arg6[%c0_29, %c0_30, %c0_31] : memref<1x2x1xf32, #tpu.memory_space<vmem>>, vector<1x2x1xf32>
      %41 = vector.shape_cast %40 : vector<1x2x1xf32> to vector<2x1xf32>
      %42 = vector.shape_cast %39 : vector<2x1xf32> to vector<1x2x1xf32>
      tpu.vector_store %arg6[%c0_29, %c0_30, %c0_31], %42 {strides = array<i32>} : memref<1x2x1xf32, #tpu.memory_space<vmem>>, vector<1x2x1xf32>,
      %cst_32 = arith.constant 0.000000e+00 : f32
      %43 = vector.broadcast %cst_32 : f32 to vector<2x1xf32>
      %c0_33 = arith.constant 0 : index
      %c0_34 = arith.constant 0 : index
      %c0_35 = arith.constant 0 : index
      %44 = vector.load %arg7[%c0_33, %c0_34, %c0_35] : memref<1x2x1xf32, #tpu.memory_space<vmem>>, vector<1x2x1xf32>
      %45 = vector.shape_cast %44 : vector<1x2x1xf32> to vector<2x1xf32>
      %46 = vector.shape_cast %43 : vector<2x1xf32> to vector<1x2x1xf32>
      tpu.vector_store %arg7[%c0_33, %c0_34, %c0_35], %46 {strides = array<i32>} : memref<1x2x1xf32, #tpu.memory_space<vmem>>, vector<1x2x1xf32>,
      %cst_36 = arith.constant 0.000000e+00 : f32
      %47 = vector.broadcast %cst_36 : f32 to vector<2x1xf32>
      %c0_37 = arith.constant 0 : index
      %c0_38 = arith.constant 0 : index
      %c0_39 = arith.constant 0 : index
      %48 = vector.load %arg8[%c0_37, %c0_38, %c0_39] : memref<1x2x1xf32, #tpu.memory_space<vmem>>, vector<1x2x1xf32>
      %49 = vector.shape_cast %48 : vector<1x2x1xf32> to vector<2x1xf32>
      %50 = vector.shape_cast %47 : vector<2x1xf32> to vector<1x2x1xf32>
      tpu.vector_store %arg8[%c0_37, %c0_38, %c0_39], %50 {strides = array<i32>} : memref<1x2x1xf32, #tpu.memory_space<vmem>>, vector<1x2x1xf32>,
    } else {
    }
    %c0 = arith.constant 0 : index
    %c0_1 = arith.constant 0 : index
    %3 = vector.load %arg5[%c0, %c0_1] : memref<2x256xf32, #tpu.memory_space<vmem>>, vector<2x256xf32>
    %c0_2 = arith.constant 0 : index
    %c0_3 = arith.constant 0 : index
    %4 = vector.load %arg3[%c0_2, %c0_3] : memref<2x256xf32, #tpu.memory_space<vmem>>, vector<2x256xf32>
    %5 = arith.mulf %4, %3 : vector<2x256xf32>
    %c0_4 = arith.constant 0 : index
    %c0_5 = arith.constant 0 : index
    %6 = vector.load %arg4[%c0_4, %c0_5] : memref<2x256xf32, #tpu.memory_space<vmem>>, vector<2x256xf32>
    %cst = arith.constant 0.000000e+00 : f32
    %cst_6 = arith.constant 1.000000e+00 : f32
    %7 = vector.broadcast %cst : f32 to vector<2x256xf32>
    %8 = arith.maximumf %7, %6 : vector<2x256xf32>
    %9 = vector.broadcast %cst_6 : f32 to vector<2x256xf32>
    %10 = arith.minimumf %9, %8 : vector<2x256xf32>
    %11 = arith.mulf %10, %3 : vector<2x256xf32>
    %c0_7 = arith.constant 0 : index
    %c0_8 = arith.constant 0 : index
    %c0_9 = arith.constant 0 : index
    %12 = vector.load %arg6[%c0_7, %c0_8, %c0_9] : memref<1x2x1xf32, #tpu.memory_space<vmem>>, vector<1x2x1xf32>
    %13 = vector.shape_cast %12 : vector<1x2x1xf32> to vector<2x1xf32>
    %14 = arith.mulf %5, %11 : vector<2x256xf32>
    %cst_10 = arith.constant dense<0.000000e+00> : vector<2xf32>
    %15 = vector.multi_reduction <add>, %14, %cst_10 [1] : vector<2x256xf32> to vector<2xf32>
    %16 = vector.shape_cast %15 : vector<2xf32> to vector<2x1xf32>
    %17 = arith.addf %13, %16 : vector<2x1xf32>
    %c0_11 = arith.constant 0 : index
    %c0_12 = arith.constant 0 : index
    %c0_13 = arith.constant 0 : index
    %18 = vector.load %arg6[%c0_11, %c0_12, %c0_13] : memref<1x2x1xf32, #tpu.memory_space<vmem>>, vector<1x2x1xf32>
    %19 = vector.shape_cast %18 : vector<1x2x1xf32> to vector<2x1xf32>
    %20 = vector.shape_cast %17 : vector<2x1xf32> to vector<1x2x1xf32>
    tpu.vector_store %arg6[%c0_11, %c0_12, %c0_13], %20 {strides = array<i32>} : memref<1x2x1xf32, #tpu.memory_space<vmem>>, vector<1x2x1xf32>,
    %c0_14 = arith.constant 0 : index
    %c0_15 = arith.constant 0 : index
    %c0_16 = arith.constant 0 : index
    %21 = vector.load %arg7[%c0_14, %c0_15, %c0_16] : memref<1x2x1xf32, #tpu.memory_space<vmem>>, vector<1x2x1xf32>
    %22 = vector.shape_cast %21 : vector<1x2x1xf32> to vector<2x1xf32>
    %23 = arith.mulf %5, %5 : vector<2x256xf32>
    %cst_17 = arith.constant dense<0.000000e+00> : vector<2xf32>
    %24 = vector.multi_reduction <add>, %23, %cst_17 [1] : vector<2x256xf32> to vector<2xf32>
    %25 = vector.shape_cast %24 : vector<2xf32> to vector<2x1xf32>
    %26 = arith.addf %22, %25 : vector<2x1xf32>
    %c0_18 = arith.constant 0 : index
    %c0_19 = arith.constant 0 : index
    %c0_20 = arith.constant 0 : index
    %27 = vector.load %arg7[%c0_18, %c0_19, %c0_20] : memref<1x2x1xf32, #tpu.memory_space<vmem>>, vector<1x2x1xf32>
    %28 = vector.shape_cast %27 : vector<1x2x1xf32> to vector<2x1xf32>
    %29 = vector.shape_cast %26 : vector<2x1xf32> to vector<1x2x1xf32>
    tpu.vector_store %arg7[%c0_18, %c0_19, %c0_20], %29 {strides = array<i32>} : memref<1x2x1xf32, #tpu.memory_space<vmem>>, vector<1x2x1xf32>,
    %c0_21 = arith.constant 0 : index
    %c0_22 = arith.constant 0 : index
    %c0_23 = arith.constant 0 : index
    %30 = vector.load %arg8[%c0_21, %c0_22, %c0_23] : memref<1x2x1xf32, #tpu.memory_space<vmem>>, vector<1x2x1xf32>
    %31 = vector.shape_cast %30 : vector<1x2x1xf32> to vector<2x1xf32>
    %32 = arith.mulf %11, %11 : vector<2x256xf32>
    %cst_24 = arith.constant dense<0.000000e+00> : vector<2xf32>
    %33 = vector.multi_reduction <add>, %32, %cst_24 [1] : vector<2x256xf32> to vector<2xf32>
    %34 = vector.shape_cast %33 : vector<2xf32> to vector<2x1xf32>
    %35 = arith.addf %31, %34 : vector<2x1xf32>
    %c0_25 = arith.constant 0 : index
    %c0_26 = arith.constant 0 : index
    %c0_27 = arith.constant 0 : index
    %36 = vector.load %arg8[%c0_25, %c0_26, %c0_27] : memref<1x2x1xf32, #tpu.memory_space<vmem>>, vector<1x2x1xf32>
    %37 = vector.shape_cast %36 : vector<1x2x1xf32> to vector<2x1xf32>
    %38 = vector.shape_cast %35 : vector<2x1xf32> to vector<1x2x1xf32>
    tpu.vector_store %arg8[%c0_25, %c0_26, %c0_27], %38 {strides = array<i32>} : memref<1x2x1xf32, #tpu.memory_space<vmem>>, vector<1x2x1xf32>,
    return
  }
  func.func @transform_0(%arg0: i32, %arg1: i32, %arg2: i32) -> (i32, i32) {
    %c1_i32 = arith.constant 1 : i32
    %0 = arith.muli %arg0, %c1_i32 : i32
    %1 = arith.addi %0, %arg2 : i32
    %c0_i32 = arith.constant 0 : i32
    %2 = arith.minsi %1, %c0_i32 : i32
    %c0_i32_0 = arith.constant 0 : i32
    return %arg1, %2 : i32, i32
  }
  func.func @transform_1(%arg0: i32, %arg1: i32, %arg2: i32) -> (i32, i32) {
    %c1_i32 = arith.constant 1 : i32
    %0 = arith.muli %arg0, %c1_i32 : i32
    %1 = arith.addi %0, %arg2 : i32
    %c0_i32 = arith.constant 0 : i32
    %2 = arith.minsi %1, %c0_i32 : i32
    %c0_i32_0 = arith.constant 0 : i32
    return %arg1, %2 : i32, i32
  }
  func.func @transform_2(%arg0: i32, %arg1: i32, %arg2: i32) -> (i32, i32) {
    %c1_i32 = arith.constant 1 : i32
    %0 = arith.muli %arg0, %c1_i32 : i32
    %1 = arith.addi %0, %arg2 : i32
    %c0_i32 = arith.constant 0 : i32
    %2 = arith.minsi %1, %c0_i32 : i32
    %c0_i32_0 = arith.constant 0 : i32
    return %arg1, %2 : i32, i32
  }
  func.func @transform_3(%arg0: i32, %arg1: i32, %arg2: i32) -> (i32, i32, i32) {
    %c0_i32 = arith.constant 0 : i32
    %c0_i32_0 = arith.constant 0 : i32
    return %arg0, %arg1, %c0_i32 : i32, i32, i32
  }
  func.func @transform_4(%arg0: i32, %arg1: i32, %arg2: i32) -> (i32, i32, i32) {
    %c0_i32 = arith.constant 0 : i32
    %c0_i32_0 = arith.constant 0 : i32
    return %arg0, %arg1, %c0_i32 : i32, i32, i32
  }
  func.func @transform_5(%arg0: i32, %arg1: i32, %arg2: i32) -> (i32, i32, i32) {
    %c0_i32 = arith.constant 0 : i32
    %c0_i32_0 = arith.constant 0 : i32
    return %arg0, %arg1, %c0_i32 : i32, i32, i32
  }
}

</mosaic_0001>

<bundles_post_ra>
// kernel: tpu_custom_call.1
= control target key start
LH: loop header
LB: loop body
LE: loop exit
PB: predicated region body
PF: predicated region fallthrough
CT: control target
= control target key end

     0   :  { %11 = vsyncpa [#allocation3], 0  ;;  %s340_s0 = inlined_call_operand.hbm [shape: f32[2,256], index: 0, kind: input, shape index: {}]   ;;  %s341_s1 = inlined_call_operand.hbm [shape: f32[2,256], index: 1, kind: input, shape index: {}]   ;;  %s342_s2 = inlined_call_operand.vmem [shape: f32[2,256], index: 2, kind: input, shape index: {}]   ;;  %s343_s3 = inlined_call_operand.vmem [shape: f32[1,2,1], index: 3, kind: output, shape index: {0}]   ;;  %s344_s4 = inlined_call_operand.vmem [shape: f32[1,2,1], index: 4, kind: output, shape index: {1}]   ;;  %s345_s5 = inlined_call_operand.vmem [shape: f32[1,2,1], index: 5, kind: output, shape index: {2}]  }
   0x1   :  { %12 = vsyncpa [#allocation5], 0  ;;  %s246_s18 = smov [#allocation2]   ;;  %s247_s20 = smov [#allocation4]  }
   0x2   :  { %s25_s19 = sshll.u32 %s246_s18, 4  ;;  %s41_s21 = sshll.u32 %s247_s20, 4  ;;  %s26_s19 = int_to_ptr.vmem [resolvable:$true] %s25_s19  ;;  %s42_s21 = int_to_ptr.vmem [resolvable:$true] %s41_s21 }
   0x3   :  { %s198_s24 = scalar_lea.hbm %s340_s0, 64 }
   0x4   :  { %p199_p0 = scmp.ne.s32.totalorder %s340_s0, %s198_s24  ;;  %p202_p1 = scmp.lt.u32.totalorder %s198_s24, %s340_s0 }
   0x6   :  { %p204_p2 = pnand %p202_p1, %p199_p0 }
   0x8   :  { %207 = shalt.err (!%p204_p2)
}
   0x9   :  { %s208_s29 = scalar_lea.vmem %s26_s19, 64  ;;  %p213_p4 = scmp.lt.s32.totalorder %s26_s19, %s26_s19 }
   0xa   :  { %p209_p3 = scmp.ne.s32.totalorder %s26_s19, %s208_s29  ;;  %p214_p5 = scmp.lt.s32.totalorder %s208_s29, %s208_s29 }
   0xc   :  { %p215_p6 = por %p214_p5, %p213_p4 }
   0xe   :  { %p216_p7 = pnand %p215_p6, %p209_p3 }
  0x10   :  { %219 = shalt.err (!%p216_p7)
}
  0x11   :  { %28 = dma.hbm_to_vmem [thread:$0]  %s340_s0, 64, %s26_s19, [#allocation3]  }
  0x12   :  { %s220_s9 = scalar_lea.hbm %s341_s1, 64 }
  0x13   :  { %p221_p8 = scmp.ne.s32.totalorder %s341_s1, %s220_s9  ;;  %p224_p9 = scmp.lt.u32.totalorder %s220_s9, %s341_s1 }
  0x15   :  { %p226_p10 = pnand %p224_p9, %p221_p8 }
  0x17   :  { %229 = shalt.err (!%p226_p10)
}
  0x18   :  { %s230_s14 = scalar_lea.vmem %s42_s21, 64  ;;  %p235_p12 = scmp.lt.s32.totalorder %s42_s21, %s42_s21 }
  0x19   :  { %p231_p11 = scmp.ne.s32.totalorder %s42_s21, %s230_s14  ;;  %p236_p13 = scmp.lt.s32.totalorder %s230_s14, %s230_s14 }
  0x1b   :  { %p237_p0 = por %p236_p13, %p235_p12 }
  0x1d   :  { %p238_p1 = pnand %p237_p0, %p231_p11 }
  0x1f   :  { %241 = shalt.err (!%p238_p1)
}
  0x20   :  { %44 = dma.hbm_to_vmem [thread:$0]  %s341_s1, 64, %s42_s21, [#allocation5]  }
  0x21   :  { %242 = dma.done.wait [#allocation3], 64  }
  0x22   :  { %243 = vsyncadd [#allocation3], 4294967232 }
  0x23   :  { %244 = dma.done.wait [#allocation5], 64  }
  0x24   :  { %245 = vsyncadd [#allocation5], 4294967232  ;;  %vm97_vm0 = vcmask 1024   ;;  %v248_v0 = vmov 1983009808   ;;  %v114_v2 = vlaneseq  ;;  %v249_v3 = vmov 0.0  }
  0x25   :  { %v112_v1 = vunpack.c.l.s4 %v248_v0  ;;  %98 = vst.msk [vmem:[%s343_s3] sm:$0x3] %vm97_vm0, %v249_v3  ;;  %99 = vst.msk [vmem:[%s344_s4] sm:$0x3] %vm97_vm0, %v249_v3  ;;  %v101_v6 = vld [vmem:[%s342_s2] sm:$0xf] }
  0x26   :  { %100 = vst.msk [vmem:[%s345_s5] sm:$0x3] %vm97_vm0, %v249_v3  ;;  %v115_v5 = vshrl.u32 %v114_v2, 7  ;;  %v102_v7 = vld [vmem:[#allocation2] sm:$0xf]  ;;  %vm121_vm1 = vcmask 1041408  }
  0x27   :  { %v113_v4 = vunpack.c.0.s8 %v112_v1  ;;  %v104_v8 = vld [vmem:[#allocation4] sm:$0xf]  ;;  %v103_v9 = vmul.f32 %v102_v7, %v101_v6 }
  0x28   :  { %v105_v10 = vmax.f32 %v104_v8, 0.0 }
  0x29   :  { %v116_v12 = vsub.s32 %v113_v4, %v115_v5  ;;  %v131_v13 = vmul.f32 %v103_v9, %v103_v9 }
  0x2a   :  { %v106_v11 = vmin.f32 %v105_v10, 1.0 }
  0x2b   :  { %v139_v15 = vrot.slane %v131_v13, %v116_v12 }
  0x2c   :  { %v107_v14 = vmul.f32 %v106_v11, %v101_v6  ;;  %v108_v32 = vld [vmem:[%s343_s3] sm:$0x3] }
  0x2d   :  { %v140_v20 = vcombine.high %v139_v15, %v139_v15  ;;  %v143_v27 = vsel %vm121_vm1, %v139_v15, 0.0  ;;  %v150_v33 = vld [vmem:[%s345_s5] sm:$0x3] }
  0x2e   :  { %v109_v16 = vmul.f32 %v107_v14, %v103_v9  ;;  %v151_v17 = vmul.f32 %v107_v14, %v107_v14  ;;  %v130_v38 = vld [vmem:[%s344_s4] sm:$0x3] }
  0x2f   :  { %v144_v28 = vsel %vm121_vm1, %v140_v20, 0.0 }
  0x30   :  { %v117_v18 = vrot.slane %v109_v16, %v116_v12  ;;  %v159_v19 = vrot.slane %v151_v17, %v116_v12  ;;  %v145_v31 = vadd.f32 %v144_v28, %v143_v27 }
  0x32   :  { %v118_v21 = vcombine.high %v117_v18, %v117_v18  ;;  %v122_v22 = vsel %vm121_vm1, %v117_v18, 0.0  ;;  %v160_v23 = vcombine.high %v159_v19, %v159_v19  ;;  %v163_v24 = vsel %vm121_vm1, %v159_v19, 0.0 }
  0x34   :  { %v123_v25 = vsel %vm121_vm1, %v118_v21, 0.0  ;;  %v164_v26 = vsel %vm121_vm1, %v160_v23, 0.0 }
  0x35   :  { %v124_v29 = vadd.f32 %v123_v25, %v122_v22  ;;  %v165_v30 = vadd.f32 %v164_v26, %v163_v24 }
  0x37   :  { %125 = vadd.xlane.f32.xlu0 %v124_v29  ;;  %166 = vadd.xlane.f32.xlu1 %v165_v30 }
  0x3b   :  { %146 = vadd.xlane.f32.xlu0 %v145_v31 }
  0xc4   :  { %v126_v34 = vpop.xlane.xlu0 %125  ;;  %v167_v35 = vpop.xlane.xlu1 %166 }
  0xc5   :  { %v127_v36 = vadd.f32 %v126_v34, %v108_v32  ;;  %v168_v37 = vadd.f32 %v167_v35, %v150_v33 }
  0xc7   :  { %129 = vst.msk [vmem:[%s343_s3] sm:$0x3] %vm97_vm0, %v127_v36  ;;  %169 = vst.msk [vmem:[%s345_s5] sm:$0x3] %vm97_vm0, %v168_v37 }
  0xc8   :  { %v147_v39 = vpop.xlane.xlu0 %146 }
  0xc9   :  { %v148_v40 = vadd.f32 %v147_v39, %v130_v38 }
  0xcb   :  { %149 = vst.msk [vmem:[%s344_s4] sm:$0x3] %vm97_vm0, %v148_v40 }
  0xcc   :  { %182 = vsyncpa [#allocation3], 1 }
  0xcd   :  { %183 = vsyncpa [#allocation5], 1 }

</bundles_post_ra>
